<compile_context>
chip_gen: v6e
topology: v6e:2x2x1
jax: 0.10.0
libtpu: 0.0.40
codegen_flags: <defaults>
</compile_context>

<pallas_src>
import math
import functools

import jax
import jax.numpy as jnp
from jax import lax
from jax.experimental import pallas as pl
from jax.experimental.pallas import tpu as pltpu


# --------------------------- tiling helper ---------------------------

def _pick_block(n, preferred):
    """Largest block <= preferred that evenly divides n (8-aligned so the
    (8,128) BlockSpec granularity rule holds); falls back to the full dim."""
    if n <= preferred:
        return n
    for cand in range(preferred, 7, -1):
        if cand % 8 == 0 and n % cand == 0:
            return cand
    # TODO(synk): truly ragged dims (no 8-aligned divisor) need masked partial blocks.
    return n


# ---------------- fused QKV projection (tiled bf16 MXU matmul) ----------------

def _matmul_bias_kernel(x_ref, w_ref, b_ref, o_ref, acc_ref):
    # grid = (M//tm, N//tn, K//tk); K (reduction) is the last, "arbitrary" axis.
    @pl.when(pl.program_id(2) == 0)
    def _init():
        acc_ref[...] = jnp.zeros_like(acc_ref)

    # bf16 operands on the MXU (w is stored bf16), f32 accumulation.
    acc_ref[...] += jnp.dot(x_ref[...].astype(jnp.bfloat16), w_ref[...],
                            preferred_element_type=jnp.float32)

    @pl.when(pl.program_id(2) == pl.num_programs(2) - 1)
    def _finalize():
        o_ref[...] = (acc_ref[...] + b_ref[...]).astype(o_ref.dtype)


def linear(x, w, b, *, tm=256, tn=256, tk=512):
    """x: (M, K) f32 @ w: (K, N) bf16 + b: (N,) f32 -> (M, N) f32."""
    M, K = x.shape
    N = w.shape[1]
    tm, tn, tk = _pick_block(M, tm), _pick_block(N, tn), _pick_block(K, tk)
    return pl.pallas_call(
        _matmul_bias_kernel,
        out_shape=jax.ShapeDtypeStruct((M, N), x.dtype),
        grid=(M // tm, N // tn, K // tk),
        in_specs=[
            pl.BlockSpec((tm, tk), lambda i, j, k: (i, k)),
            pl.BlockSpec((tk, tn), lambda i, j, k: (k, j)),
            pl.BlockSpec((1, tn), lambda i, j, k: (0, j)),
        ],
        out_specs=pl.BlockSpec((tm, tn), lambda i, j, k: (i, j)),
        scratch_shapes=[pltpu.VMEM((tm, tn), jnp.float32)],
        compiler_params=pltpu.CompilerParams(
            dimension_semantics=("parallel", "parallel", "arbitrary"),
            vmem_limit_bytes=64 * 1024 * 1024),
    )(x, w, b.reshape(1, N))


# ------------------- in-place KV-cache writeback (1 DMA / batch) -------------------

def _kv_cache_update_kernel(start_ref, new_ref, cache_in_ref, cache_out_ref, sem):
    # cache_in_ref is aliased to cache_out_ref: untouched rows keep their old
    # contents with zero copying.
    del cache_in_ref
    b = pl.program_id(0)
    seq = new_ref.shape[2]
    cp = pltpu.make_async_copy(
        new_ref.at[0],                                         # (Hkv, S, D) in VMEM
        cache_out_ref.at[b, :, pl.ds(start_ref[0], seq), :],   # HBM window at start_pos
        sem)
    cp.start()
    cp.wait()


def update_kv_cache(cache, new_hm, start_pos):
    """Write head-major new K/V (B, Hkv, S, D) into cache (MAX_B, Hkv, MAX_S, D)
    at sequence offset start_pos.  One strided DMA per batch; the cache stays in
    HBM (aliased in-place) and start_pos is a runtime SMEM scalar."""
    B, Hkv, S, D = new_hm.shape
    start = jnp.asarray([start_pos], dtype=jnp.int32)
    return pl.pallas_call(
        _kv_cache_update_kernel,
        out_shape=jax.ShapeDtypeStruct(cache.shape, cache.dtype),
        grid=(B,),
        in_specs=[
            pl.BlockSpec(memory_space=pltpu.MemorySpace.SMEM),      # start_pos scalar
            pl.BlockSpec((1, Hkv, S, D), lambda b: (b, 0, 0, 0)),   # new tokens
            pl.BlockSpec(memory_space=pl.ANY),                      # cache stays in HBM
        ],
        out_specs=pl.BlockSpec(memory_space=pl.ANY),
        scratch_shapes=[pltpu.SemaphoreType.DMA(())],
        input_output_aliases={2: 0},
        compiler_params=pltpu.CompilerParams(
            dimension_semantics=("arbitrary",)),
    )(start, new_hm, cache)


# ---------------------- flash attention over the (bf16) cache ----------------------

def _flash_attention_kernel(kvlen_ref, q_ref, k_ref, v_ref, o_ref,
                            qs_ref, m_ref, l_ref, acc_ref, *, scale, block_kv):
    t = pl.program_id(2)
    kv_len = kvlen_ref[0]

    @pl.when(t == 0)
    def _init():
        # Stage head-major, pre-scaled bf16 Q once per (batch, q-block); not per
        # KV tile.
        qs_ref[...] = (jnp.transpose(q_ref[0], (1, 0, 2)) * scale).astype(qs_ref.dtype)
        m_ref[...] = jnp.full_like(m_ref, -jnp.inf)
        l_ref[...] = jnp.zeros_like(l_ref)
        acc_ref[...] = jnp.zeros_like(acc_ref)

    @pl.when(t * block_kv < kv_len)        # skip KV tiles entirely past the live length
    def _compute():
        q = qs_ref[...]                    # (H,  bq,  D) bf16
        k = k_ref[0]                       # (Hkv, bkv, D) bf16
        v = v_ref[0]                       # (Hkv, bkv, D) bf16

        # All heads in one batched MXU matmul; head-major operands contract over
        # the two minor dims, so no per-tile relayout/transposes are needed.
        s = jnp.einsum("hqd,hkd->hqk", q, k,
                       preferred_element_type=jnp.float32)        # (H, bq, bkv) f32

        # Length mask: cheap (1, bkv) iota broadcast, finite fill (never NaN).
        kv_pos = t * block_kv + lax.broadcasted_iota(jnp.int32, (1, block_kv), 1)
        s = jnp.where((kv_pos < kv_len)[:, None, :], s, -1e30)

        m_prev = m_ref[...]                                        # (H, bq)
        m_new = jnp.maximum(m_prev, jnp.max(s, axis=-1))
        alpha = jnp.exp(m_prev - m_new)
        p = jnp.exp(s - m_new[..., None])                          # f32

        l_ref[...] = alpha * l_ref[...] + jnp.sum(p, axis=-1)
        acc_ref[...] = alpha[..., None] * acc_ref[...] + jnp.einsum(
            "hqk,hkd->hqd", p.astype(v.dtype), v,
            preferred_element_type=jnp.float32)                    # (H, bq, D)
        m_ref[...] = m_new

    @pl.when(t == pl.num_programs(2) - 1)
    def _finalize():
        inv_l = pl.reciprocal(l_ref[...], approx=True)             # EUP slot, ~free
        out = acc_ref[...] * inv_l[..., None]                      # (H, bq, D) f32
        H = out.shape[0]
        # Lane-dense store: one (bq, H*D) block (per-head lane concat), so the
        # HBM writeback is a wide unmasked store and the wrapper needs no reshape.
        o_ref[0] = jnp.concatenate([out[h] for h in range(H)],
                                   axis=-1).astype(o_ref.dtype)


def flash_attention(q, k_cache, v_cache, kv_len, head_dim):
    """q: (B, S, H, D) f32; k_cache/v_cache: (MAX_B, Hkv, MAX_S, D) bf16 (head-major).
    Returns (B, S, H*D).  Grid covers MAX_S//block_kv so kv_len is a runtime scalar
    (scalar prefetch): no recompile per decode step; dead tiles are skipped."""
    B, S, H, D = q.shape
    Hkv, MAX_S = k_cache.shape[1], k_cache.shape[2]
    block_kv = _pick_block(MAX_S, 256)     # modest default so v7x (64 MiB VMEM) fits
    block_q = _pick_block(S, 256)
    n_q = S // block_q
    n_kv = MAX_S // block_kv
    kv_len_arr = jnp.asarray([kv_len], dtype=jnp.int32)

    def q_map(b, qi, t, kvlen):
        return (b, qi, 0, 0)

    def kv_map(b, qi, t, kvlen):
        # Clamp dead-tile fetches onto the last live block (no wasted new DMAs).
        last = (kvlen[0] + block_kv - 1) // block_kv - 1
        return (b, 0, jnp.minimum(t, last), 0)

    def o_map(b, qi, t, kvlen):
        return (b, qi, 0)

    kern = functools.partial(_flash_attention_kernel,
                             scale=1.0 / math.sqrt(head_dim),
                             block_kv=block_kv)
    return pl.pallas_call(
        kern,
        out_shape=jax.ShapeDtypeStruct((B, S, H * D), q.dtype),
        grid_spec=pltpu.PrefetchScalarGridSpec(
            num_scalar_prefetch=1,
            grid=(B, n_q, n_kv),
            in_specs=[
                pl.BlockSpec((1, block_q, H, D), q_map),
                pl.BlockSpec((1, Hkv, block_kv, D), kv_map),
                pl.BlockSpec((1, Hkv, block_kv, D), kv_map),
            ],
            out_specs=pl.BlockSpec((1, block_q, H * D), o_map),
            scratch_shapes=[
                pltpu.VMEM((H, block_q, D), jnp.bfloat16),   # staged scaled Q
                pltpu.VMEM((H, block_q), jnp.float32),       # running max
                pltpu.VMEM((H, block_q), jnp.float32),       # running sum
                pltpu.VMEM((H, block_q, D), jnp.float32),    # output accumulator
            ]),
        compiler_params=pltpu.CompilerParams(
            dimension_semantics=("parallel", "parallel", "arbitrary")),
    )(kv_len_arr, q, k_cache, v_cache)


# ------------------------------------ JAX glue ------------------------------------

def apply_rotary_embeddings(x, cos, sin):
    """x: (B, S, H, D); cos/sin: (S, D//2). Adjacent-pair (complex) RoPE as in Llama."""
    B, S, H, D = x.shape
    xp = x.reshape(B, S, H, D // 2, 2)
    xr, xi = xp[..., 0], xp[..., 1]
    c = cos[None, :, None, :]
    s = sin[None, :, None, :]
    out_r = xr * c - xi * s
    out_i = xr * s + xi * c
    return jnp.stack([out_r, out_i], axis=-1).reshape(B, S, H, D).astype(x.dtype)


class SelfAttentionPallas:
    def __init__(self, dim, n_heads, n_kv_heads, max_batch, max_seq, key):
        self.n_kv_heads = n_kv_heads
        self.n_heads_q = n_heads
        self.n_rep = n_heads // n_kv_heads
        # TODO(synk): the reference forward views xk/xv with n_heads_q, so it is only
        # self-consistent for n_rep == 1; GQA (n_rep > 1) would need kv_head = h // n_rep
        # mapping inside flash_attention instead of repeat_kv.
        assert self.n_rep == 1, "reference forward is only valid for n_kv_heads == n_heads"
        self.head_dim = dim // n_heads

        def init_linear(k, fan_in, fan_out):
            kw, kb = jax.random.split(k)
            bound = 1.0 / math.sqrt(fan_in)
            # stored as (in, out) so the kernel computes x @ W + b (== torch Linear)
            w = jax.random.uniform(kw, (fan_in, fan_out), jnp.float32, -bound, bound)
            b = jax.random.uniform(kb, (fan_out,), jnp.float32, -bound, bound)
            return w, b

        k1, k2, k3, k4 = jax.random.split(key, 4)
        self.wq, self.bq = init_linear(k1, dim, n_heads * self.head_dim)
        self.wk, self.bk = init_linear(k2, dim, n_kv_heads * self.head_dim)
        self.wv, self.bv = init_linear(k3, dim, n_kv_heads * self.head_dim)
        # wo exists in __init__ but (like the reference forward) is never applied.
        self.wo, self.bo = init_linear(k4, n_heads * self.head_dim, dim)

        # Fused QKV weight (bf16 for MXU / weight bandwidth), bias kept f32.
        self.w_qkv = jnp.concatenate([self.wq, self.wk, self.wv], axis=1).astype(jnp.bfloat16)
        self.b_qkv = jnp.concatenate([self.bq, self.bk, self.bv], axis=0)
        self.nq = n_heads * self.head_dim
        self.nkv = n_kv_heads * self.head_dim

        # bf16, HEAD-MAJOR KV cache: (MAX_B, Hkv, MAX_S, D).
        self.cache_k = jnp.zeros((max_batch, n_kv_heads, max_seq, self.head_dim), jnp.bfloat16)
        self.cache_v = jnp.zeros((max_batch, n_kv_heads, max_seq, self.head_dim), jnp.bfloat16)

    def __call__(self, x, start_pos, cos, sin):
        B, S, dim = x.shape
        H, D = self.n_heads_q, self.head_dim
        Hkv = self.n_kv_heads

        # Fused, tiled QKV projection (bf16 MXU operands, f32 accumulation).
        x2d = x.reshape(B * S, dim)
        qkv = linear(x2d, self.w_qkv, self.b_qkv)                      # (B*S, (H+2Hkv)*D)
        xq = qkv[:, :self.nq].reshape(B, S, H, D)
        xk = qkv[:, self.nq:self.nq + self.nkv].reshape(B, S, Hkv, D)
        xv = qkv[:, self.nq + self.nkv:].reshape(B, S, Hkv, D)

        xq = apply_rotary_embeddings(xq, cos, sin)
        xk = apply_rotary_embeddings(xk, cos, sin)

        # Head-major bf16 new K/V (new tokens only), then one aliased DMA per batch.
        xk_hm = jnp.transpose(xk, (0, 2, 1, 3)).astype(self.cache_k.dtype)
        xv_hm = jnp.transpose(xv, (0, 2, 1, 3)).astype(self.cache_v.dtype)
        self.cache_k = update_kv_cache(self.cache_k, xk_hm, start_pos)
        self.cache_v = update_kv_cache(self.cache_v, xv_hm, start_pos)

        # Flash attention straight out of the bf16 cache; output already (B, S, H*D).
        kv_len = start_pos + S
        return flash_attention(xq, self.cache_k, self.cache_v, kv_len, D)


# ------------------------------------ reference ------------------------------------

def reference_forward(mod, x, start_pos, cos, sin):
    B, S, dim = x.shape
    H, D = mod.n_heads_q, mod.head_dim
    x2d = x.reshape(B * S, dim)
    xq = (x2d @ mod.wq + mod.bq).reshape(B, S, H, D)
    xk = (x2d @ mod.wk + mod.bk).reshape(B, S, H, D)
    xv = (x2d @ mod.wv + mod.bv).reshape(B, S, H, D)
    xq = apply_rotary_embeddings(xq, cos, sin)
    xk = apply_rotary_embeddings(xk, cos, sin)
    keys = xk[:, 0:start_pos + S]      # start_pos == 0 in demo; cache slice == xk
    values = xv[:, 0:start_pos + S]
    q = jnp.transpose(xq, (0, 2, 1, 3))
    k = jnp.transpose(keys, (0, 2, 1, 3))
    v = jnp.transpose(values, (0, 2, 1, 3))
    scores = jnp.einsum("bhqd,bhkd->bhqk", q, k) / math.sqrt(D)
    p = jax.nn.softmax(scores.astype(jnp.float32), axis=-1).astype(q.dtype)
    out = jnp.einsum("bhqk,bhkd->bhqd", p, v)
    return jnp.transpose(out, (0, 2, 1, 3)).reshape(B, S, H * D)


# -------------------------------------- main ---------------------------------------

if __name__ == "__main__":
    DIM, N_HEADS, N_KV_HEADS = 32, 4, 4
    MAX_BATCH, MAX_SEQ = 2, 16
    B, S, START_POS = 2, 8, 0
    HEAD_DIM = DIM // N_HEADS

    key = jax.random.PRNGKey(0)
    k_param, k_x = jax.random.split(key)

    mod = SelfAttentionPallas(DIM, N_HEADS, N_KV_HEADS, MAX_BATCH, MAX_SEQ, k_param)

    x = jax.random.normal(k_x, (B, S, DIM), jnp.float32)

    # freqs_complex equivalent: cos/sin tables of shape (S, head_dim // 2)
    inv_freq = 1.0 / (10000.0 ** (jnp.arange(0, HEAD_DIM, 2, dtype=jnp.float32) / HEAD_DIM))
    t = jnp.arange(START_POS, START_POS + S, dtype=jnp.float32)
    angles = jnp.outer(t, inv_freq)                 # (S, head_dim//2)
    cos, sin = jnp.cos(angles), jnp.sin(angles)

    out = mod(x, START_POS, cos, sin)
    out = jax.block_until_ready(out)

    ref = reference_forward(mod, x, START_POS, cos, sin)
    assert out.shape == (B, S, N_HEADS * HEAD_DIM)
    # bf16 weights / bf16 KV cache / bf16 MXU operands + approx reciprocal vs f32 reference.
    assert jnp.allclose(out, ref, atol=3e-2, rtol=3e-2), "mismatch vs reference"

    # cache must hold the (RoPE'd) keys for the new tokens (head-major, bf16), and
    # positions past kv_len must be untouched (still zero) thanks to the aliasing.
    expected_k = apply_rotary_embeddings(
        (x.reshape(B * S, DIM) @ mod.wk + mod.bk).reshape(B, S, N_KV_HEADS, HEAD_DIM),
        cos, sin)
    cache_k_bshd = jnp.transpose(mod.cache_k[:B, :, :S, :].astype(jnp.float32), (0, 2, 1, 3))
    assert jnp.allclose(cache_k_bshd, expected_k, atol=3e-2, rtol=3e-2)
    assert jnp.all(mod.cache_k[:, :, S:, :] == 0)

    print("KERNEL_OK")
</pallas_src>

<mosaic_0001>
module attributes {stable_mosaic.version = 11 : i64} {
  func.func @_matmul_bias_kernel(%arg0: i32, %arg1: i32, %arg2: i32, %arg3: memref<16x32xf32, #tpu.memory_space<vmem>>, %arg4: memref<32x96xbf16, #tpu.memory_space<vmem>>, %arg5: memref<1x96xf32, #tpu.memory_space<vmem>>, %arg6: memref<16x96xf32, #tpu.memory_space<vmem>>, %arg7: memref<16x96xf32, #tpu.memory_space<vmem>>) attributes {dimension_semantics = [#tpu.dimension_semantics<parallel>, #tpu.dimension_semantics<parallel>, #tpu.dimension_semantics<arbitrary>], iteration_bounds = array<i64: 1, 1, 1>, scalar_prefetch = 0 : i64, scratch_operands = 1 : i64, tpu.core_type = #tpu.core_type<tc>, window_params = [{transform_indices = @transform_0, window_bounds = array<i64: 16, 32>}, {transform_indices = @transform_1, window_bounds = array<i64: 32, 96>}, {transform_indices = @transform_2, window_bounds = array<i64: 1, 96>}, {transform_indices = @transform_3, window_bounds = array<i64: 16, 96>}]} {
    %c0_i32 = arith.constant 0 : i32
    %0 = arith.cmpi eq, %arg2, %c0_i32 : i32
    %1 = arith.extui %0 : i1 to i32
    %c0_i32_0 = arith.constant 0 : i32
    %2 = arith.cmpi ne, %1, %c0_i32_0 : i32
    scf.if %2 {
      %cst_10 = arith.constant 0.000000e+00 : f32
      %13 = vector.broadcast %cst_10 : f32 to vector<16x96xf32>
      %c0_11 = arith.constant 0 : index
      %c0_12 = arith.constant 0 : index
      %14 = vector.load %arg7[%c0_11, %c0_12] : memref<16x96xf32, #tpu.memory_space<vmem>>, vector<16x96xf32>
      tpu.vector_store %arg7[%c0_11, %c0_12], %13 {strides = array<i32>} : memref<16x96xf32, #tpu.memory_space<vmem>>, vector<16x96xf32>,
    } else {
    }
    %c0 = arith.constant 0 : index
    %c0_1 = arith.constant 0 : index
    %3 = vector.load %arg7[%c0, %c0_1] : memref<16x96xf32, #tpu.memory_space<vmem>>, vector<16x96xf32>
    %c0_2 = arith.constant 0 : index
    %c0_3 = arith.constant 0 : index
    %4 = vector.load %arg3[%c0_2, %c0_3] : memref<16x32xf32, #tpu.memory_space<vmem>>, vector<16x32xf32>
    %5 = arith.truncf %4 : vector<16x32xf32> to vector<16x32xbf16>
    %c0_4 = arith.constant 0 : index
    %c0_5 = arith.constant 0 : index
    %6 = vector.load %arg4[%c0_4, %c0_5] : memref<32x96xbf16, #tpu.memory_space<vmem>>, vector<32x96xbf16>
    %cst = arith.constant dense<0.000000e+00> : vector<16x96xf32>
    %7 = tpu.matmul %5, %6, %cst {dimension_numbers = #tpu.dot_dimension_numbers<[1], [0], [0], [1], [0, 0, 1, 1], [], []>} : vector<16x32xbf16>, vector<32x96xbf16>, vector<16x96xf32> -> vector<16x96xf32>
    %8 = arith.addf %3, %7 : vector<16x96xf32>
    %c0_6 = arith.constant 0 : index
    %c0_7 = arith.constant 0 : index
    %9 = vector.load %arg7[%c0_6, %c0_7] : memref<16x96xf32, #tpu.memory_space<vmem>>, vector<16x96xf32>
    tpu.vector_store %arg7[%c0_6, %c0_7], %8 {strides = array<i32>} : memref<16x96xf32, #tpu.memory_space<vmem>>, vector<16x96xf32>,
    %c0_i32_8 = arith.constant 0 : i32
    %10 = arith.cmpi eq, %arg2, %c0_i32_8 : i32
    %11 = arith.extui %10 : i1 to i32
    %c0_i32_9 = arith.constant 0 : i32
    %12 = arith.cmpi ne, %11, %c0_i32_9 : i32
    scf.if %12 {
      %c0_10 = arith.constant 0 : index
      %c0_11 = arith.constant 0 : index
      %13 = vector.load %arg7[%c0_10, %c0_11] : memref<16x96xf32, #tpu.memory_space<vmem>>, vector<16x96xf32>
      %c0_12 = arith.constant 0 : index
      %c0_13 = arith.constant 0 : index
      %14 = vector.load %arg5[%c0_12, %c0_13] : memref<1x96xf32, #tpu.memory_space<vmem>>, vector<1x96xf32>
      %15 = vector.broadcast %14 : vector<1x96xf32> to vector<16x96xf32>
      %16 = arith.addf %13, %15 : vector<16x96xf32>
      %c0_14 = arith.constant 0 : index
      %c0_15 = arith.constant 0 : index
      %17 = vector.load %arg6[%c0_14, %c0_15] : memref<16x96xf32, #tpu.memory_space<vmem>>, vector<16x96xf32>
      tpu.vector_store %arg6[%c0_14, %c0_15], %16 {strides = array<i32>} : memref<16x96xf32, #tpu.memory_space<vmem>>, vector<16x96xf32>,
    } else {
    }
    return
  }
  func.func @transform_0(%arg0: i32, %arg1: i32, %arg2: i32) -> (i32, i32) {
    %c0_i32 = arith.constant 0 : i32
    return %arg0, %arg2 : i32, i32
  }
  func.func @transform_1(%arg0: i32, %arg1: i32, %arg2: i32) -> (i32, i32) {
    %c0_i32 = arith.constant 0 : i32
    return %arg2, %arg1 : i32, i32
  }
  func.func @transform_2(%arg0: i32, %arg1: i32, %arg2: i32) -> (i32, i32) {
    %c0_i32 = arith.constant 0 : i32
    %c0_i32_0 = arith.constant 0 : i32
    return %c0_i32, %arg1 : i32, i32
  }
  func.func @transform_3(%arg0: i32, %arg1: i32, %arg2: i32) -> (i32, i32) {
    %c0_i32 = arith.constant 0 : i32
    return %arg0, %arg1 : i32, i32
  }
}

</mosaic_0001>

<bundles_post_ra>
// kernel: tpu_custom_call.1
= control target key start
LH: loop header
LB: loop body
LE: loop exit
PB: predicated region body
PF: predicated region fallthrough
CT: control target
= control target key end

     0   :  { %8 = vsyncpa [#allocation4], 0  ;;  %s301_s0 = inlined_call_operand.hbm [shape: f32[16,32], index: 0, kind: input, shape index: {}]   ;;  %s302_s1 = inlined_call_operand.hbm [shape: bf16[32,96], index: 1, kind: input, shape index: {}]   ;;  %s303_s2 = inlined_call_operand.vmem [shape: f32[1,96], index: 2, kind: input, shape index: {}]   ;;  %s304_s3 = inlined_call_operand.hbm [shape: f32[16,96], index: 3, kind: output, shape index: {}]  }
   0x1   :  { %9 = vsyncpa [#allocation7], 0 }
   0x2   :  { %10 = vsyncpa [#allocation5], 0  ;;  %s248_s12 = smov [#allocation3]  }
   0x3   :  { %s16_s13 = sshll.u32 %s248_s12, 4  ;;  %s17_s13 = int_to_ptr.vmem [resolvable:$true] %s16_s13 }
   0x4   :  { %s190_s14 = scalar_lea.vmem %s17_s13, 256  ;;  %p195_p1 = scmp.lt.s32.totalorder %s17_s13, %s17_s13 }
   0x5   :  { %p191_p0 = scmp.ne.s32.totalorder %s17_s13, %s190_s14  ;;  %p196_p2 = scmp.lt.s32.totalorder %s190_s14, %s190_s14 }
   0x7   :  { %p197_p3 = por %p196_p2, %p195_p1 }
   0x9   :  { %p198_p4 = pnand %p197_p3, %p191_p0 }
   0xb   :  { %201 = shalt.err (!%p198_p4)
}
   0xc   :  { %s249_s15 = smov 128   ;;  %s250_s16 = smov 8  }
   0xd   :  { %22 = dma.hbm_to_vmem [thread:$0]  %s301_s0, 256, %s17_s13, [#allocation4], %s249_s15, %s249_s15, %s250_s16  }
   0xe   :  { %s251_s19 = smov [#allocation6]  }
   0xf   :  { %s28_s20 = sshll.u32 %s251_s19, 4  ;;  %s29_s20 = int_to_ptr.vmem [resolvable:$true] %s28_s20 }
  0x10   :  { %s210_s21 = scalar_lea.vmem %s29_s20, 256  ;;  %p215_p6 = scmp.lt.s32.totalorder %s29_s20, %s29_s20 }
  0x11   :  { %p211_p5 = scmp.ne.s32.totalorder %s29_s20, %s210_s21  ;;  %p216_p7 = scmp.lt.s32.totalorder %s210_s21, %s210_s21 }
  0x13   :  { %p217_p8 = por %p216_p7, %p215_p6 }
  0x15   :  { %p218_p9 = pnand %p217_p8, %p211_p5 }
  0x17   :  { %221 = shalt.err (!%p218_p9)
}
  0x18   :  { %s252_s22 = smov 64   ;;  %s253_s23 = smov 4  }
  0x19   :  { %34 = dma.hbm_to_vmem [thread:$0]  %s302_s1, 256, %s29_s20, [#allocation7], %s252_s22, %s252_s22, %s253_s23  }
  0x1a   :  { %242 = dma.done.wait [#allocation4], 256  }
  0x1b   :  { %243 = vsyncadd [#allocation4], 4294967040 }
  0x1c   :  { %244 = dma.done.wait [#allocation7], 256  }
  0x1d   :  { %245 = vsyncadd [#allocation7], 4294967040  ;;  %vm48_vm0 = vcmask 785408   ;;  %v254_v0 = vmov 0.0   ;;  %vm255_vm1 = vmmov 0   ;;  %v180_v1 = vld [vmem:[#allocation6 + $0x8] sm:$0xff]  }
  0x1e   :  { %49 = vst.msk [vmem:[#allocation2] sm:$0xff] %vm48_vm0, %v254_v0  ;;  %50 = vst.msk [vmem:[#allocation2 + $0x8] sm:$0xff] %vm48_vm0, %v254_v0  ;;  %163 = vmatprep.subr.bf16.mxu0 %v254_v0  ;;  %167 = vmatprep.mubr.msk.bf16.mxu0 %vm255_vm1, %v254_v0  ;;  %v181_v2 = vld [vmem:[#allocation6] sm:$0xff]   ;;  %v53_v3 = vld [vmem:[#allocation3] sm:$0xff]  ;;  %vm72_vm2 = vcmask 261120   ;;  %s256_s26 = smov [#allocation8]  }
  0x1f   :  { %164 = vmatpush3.bf16.msra.mxu0 %v180_v1  ;;  %v54_v4 = vld [vmem:[#allocation3 + $0x8] sm:$0xff]  ;;  %v159_v14 = vld [vmem:[%s303_s2] ss:$0 sm:$0xff]  ;;  %s143_s27 = sshll.u32 %s256_s26, 4  ;;  %s144_s27 = int_to_ptr.vmem [resolvable:$true] %s143_s27 }
  0x20   :  { %165 = vmatprep.subr.bf16.mxu0 %v254_v0  ;;  %v55_v5 = vpack.c.bf16 %v54_v4, %v53_v3  ;;  %s222_s28 = scalar_lea.vmem %s144_s27, 256  ;;  %p227_p11 = scmp.lt.s32.totalorder %s144_s27, %s144_s27 }
  0x21   :  { %p223_p10 = scmp.ne.s32.totalorder %s144_s27, %s222_s28  ;;  %p228_p12 = scmp.lt.s32.totalorder %s222_s28, %s222_s28 }
  0x23   :  { %166 = vmatpush3.bf16.msra.mxu0 %v181_v2  ;;  %p229_p13 = por %p228_p12, %p227_p11 }
  0x25   :  { %v51_v6 = vld [vmem:[#allocation2] sm:$0xff]  ;;  %v52_v10 = vld [vmem:[#allocation2 + $0x8] sm:$0xff]  ;;  %p230_p0 = pnand %p229_p13, %p223_p10 }
  0x26   :  { %168 = vmatmul.mubr.msk.bf16.vlgmr.msra.gmra.mxu0 %vm72_vm2, %v55_v5 }
  0xe6   :  { %v110_v7 = vpop.f32.mrf.mxu0 }
  0xe7   :  { %v117_v8 = vadd.f32 %v110_v7, %v51_v6 }
  0xe8   :  { %v169_v9 = vpop.f32.mrf.mxu0 }
  0xe9   :  { %120 = vst.msk [vmem:[#allocation2] sm:$0xff] %vm48_vm0, %v117_v8 }
  0xea   :  { %v113_v11 = vpop.f32.mrf.mxu0 }
  0xeb   :  { %v118_v12 = vadd.f32 %v113_v11, %v52_v10 }
  0xec   :  { %v170_v13 = vpop.f32.mrf.mxu0 }
  0xed   :  { %121 = vst.msk [vmem:[#allocation2 + $0x8] sm:$0xff] %vm48_vm0, %v118_v12 }
  0xf0   :  { %v125_v15 = vld [vmem:[#allocation2] sm:$0xff] }
  0xf1   :  { %v134_v16 = vadd.f32 %v159_v14, %v125_v15 }
  0xf3   :  { %136 = vst.msk [vmem:[#allocation8] sm:$0xff] %vm48_vm0, %v134_v16 }
  0xf4   :  { %v126_v17 = vld [vmem:[#allocation2 + $0x8] sm:$0xff] }
  0xf5   :  { %v135_v18 = vadd.f32 %v159_v14, %v126_v17 }
  0xf7   :  { %137 = vst.msk [vmem:[#allocation8 + $0x8] sm:$0xff] %vm48_vm0, %v135_v18 }
  0xf8   :  { %233 = shalt.err (!%p230_p0)
}
  0xf9   :  { %149 = dma.vmem_to_hbm [thread:$0]  %s144_s27, 256, %s304_s3, [#allocation5], %s249_s15, %s249_s15, %s250_s16  }
  0xfa   :  { %246 = dma.done.wait [#allocation5], 256  }
  0xfb   :  { %247 = vsyncadd [#allocation5], 4294967040 }
  0xfc   :  { %153 = vsyncpa [#allocation4], 1 }
  0xfd   :  { %154 = vsyncpa [#allocation7], 1 }
  0xfe   :  { %155 = vsyncpa [#allocation5], 1 }

</bundles_post_ra>
